<compile_context>
chip_gen: v5e
topology: v5e:2x2
jax: 0.10.0
libtpu: 0.0.40
codegen_flags: <defaults>
</compile_context>

<pallas_src>
import functools

import jax
import jax.numpy as jnp
from jax.experimental import pallas as pl
from jax.experimental.pallas import tpu as pltpu

_MAX_TILE_E = 32768                    # flat-element tile; multiple of 128
_FUSED_VMEM_BUDGET = 20 * 1024 * 1024  # whole-problem-resident threshold
_TILE_VMEM_BUDGET = 20 * 1024 * 1024   # per-step working-set budget (tiled)
_VMEM_LIMIT_BYTES = 32 * 1024 * 1024   # safe scoped limit on v5e/v6e/v7x


def _onehot(comb, num_buckets, dtype):
    """[C, T] one-hot membership from a [1, T] int32 bucket index."""
    iota = jax.lax.broadcasted_iota(
        jnp.int32, (num_buckets,) + comb.shape[1:], 0)
    return (comb == iota).astype(dtype)


_CONTRACT_LANES = (((1,), (1,)), ((), ()))   # A . B^T (contract lane axes)
_CONTRACT_NATIVE = (((1,), (0,)), ((), ()))  # native MXU form


def _fused_zcom_kernel(x_ref, comb_ref, o_ref, *, num_buckets):
    """Whole problem resident in VMEM: means + gather + subtract in one step."""
    x = x_ref[...].astype(jnp.float32)                        # [1, E]
    comb = comb_ref[...]                                      # [1, E] int32
    onehot = _onehot(comb, num_buckets, jnp.float32)          # [C, E]

    sums = jax.lax.dot_general(x, onehot, _CONTRACT_LANES,
                               preferred_element_type=jnp.float32)   # [1, C]
    cnts = jax.lax.dot_general(jnp.ones_like(x), onehot, _CONTRACT_LANES,
                               preferred_element_type=jnp.float32)   # [1, C]
    means = sums / jnp.maximum(cnts, 1.0)                     # [1, C]

    mean_e = jax.lax.dot_general(means, onehot, _CONTRACT_NATIVE,
                                 preferred_element_type=jnp.float32)  # [1, E]
    o_ref[...] = (x - mean_e).astype(o_ref.dtype)


def _partial_sums_kernel(x_ref, comb_ref, part_ref, *, num_buckets, n_elems,
                         tile_e, tiles_per_core):
    """Tiled pass 1: per-core partial bucket sums + counts (f32)."""
    c = pl.program_id(0)          # 2-way TensorCore split (parallel axis)
    t = pl.program_id(1)          # reduction over this core's tiles

    @pl.when(t == 0)
    def _init():
        part_ref[...] = jnp.zeros_like(part_ref)

    # Tail / clamped-tile masking: padding never contributes to sums/counts.
    logical_tile = c * tiles_per_core + t
    col = logical_tile * tile_e + jax.lax.broadcasted_iota(
        jnp.int32, (1, tile_e), 1)
    valid = col < n_elems                                     # [1, T] bool

    dt = x_ref.dtype              # bf16 stays bf16 through the MXU (f32 acc)
    x = jnp.where(valid, x_ref[...], jnp.zeros([], dt))       # [1, T]
    comb = jnp.where(valid, comb_ref[...], -1)                # [1, T]
    onehot = _onehot(comb, num_buckets, dt)                   # [C, T]

    sums = jax.lax.dot_general(x, onehot, _CONTRACT_LANES,
                               preferred_element_type=jnp.float32)   # [1, C]
    cnts = jax.lax.dot_general(valid.astype(dt), onehot, _CONTRACT_LANES,
                               preferred_element_type=jnp.float32)   # [1, C]
    part_ref[...] += jnp.concatenate([sums, cnts], axis=0)[None]     # [1,2,C]


def _subtract_mean_kernel(x_ref, comb_ref, means_ref, o_ref, *, num_buckets):
    """Tiled pass 2: x - mean[bucket], gather via one-hot matmul (MXU)."""
    x = x_ref[...].astype(jnp.float32)                        # [1, T]
    onehot = _onehot(comb_ref[...], num_buckets, jnp.float32)  # [C, T]
    mean_e = jax.lax.dot_general(means_ref[...], onehot, _CONTRACT_NATIVE,
                                 preferred_element_type=jnp.float32)  # [1, T]
    o_ref[...] = (x - mean_e).astype(o_ref.dtype)


def zero_center_of_mass(x_pos: jax.Array, segment_ids: jax.Array,
                        num_segments: int, *, tile_e: int | None = None,
                        force_two_pass: bool = False):
    """Pallas equivalent of DynamicsBase.zero_center_of_mass."""
    assert x_pos.ndim == 2, "x_pos must be [N, D]"
    n, d = x_pos.shape
    assert segment_ids.shape == (n,)
    e = n * d
    c_buckets = num_segments * d
    cpad = ((c_buckets + 7) // 8) * 8
    x_bytes = x_pos.dtype.itemsize

    # Flat lane-dense views: free row-major reshapes, no transposes / copies.
    x_flat = x_pos.reshape(1, e)
    comb = (segment_ids.astype(jnp.int32)[:, None] * d
            + jnp.arange(d, dtype=jnp.int32)[None, :]).reshape(1, e)

    # ---------- fused single-launch path (whole problem resident) ----------
    fused_vmem = e * (128 + 4 * cpad)   # x/out/comb (8-sublane pad) + one-hot
    if (not force_two_pass) and tile_e is None and fused_vmem <= _FUSED_VMEM_BUDGET:
        out_flat = pl.pallas_call(
            functools.partial(_fused_zcom_kernel, num_buckets=c_buckets),
            out_shape=jax.ShapeDtypeStruct((1, e), x_pos.dtype),
            grid_spec=pltpu.PrefetchScalarGridSpec(
                num_scalar_prefetch=0,
                grid=(1,),
                in_specs=[pl.BlockSpec((1, e), lambda i: (0, 0)),
                          pl.BlockSpec((1, e), lambda i: (0, 0))],
                out_specs=pl.BlockSpec((1, e), lambda i: (0, 0))),
            compiler_params=pltpu.CompilerParams(
                dimension_semantics=("arbitrary",),
                vmem_limit_bytes=_VMEM_LIMIT_BYTES),
            cost_estimate=pl.CostEstimate(
                flops=6 * e * c_buckets, transcendentals=0,
                bytes_accessed=e * (2 * x_bytes + 4)),
        )(x_flat, comb)
        return out_flat.reshape(n, d)

    # --------------------- tiled two-pass path (large N) -------------------
    if tile_e is None:
        budget_t = _TILE_VMEM_BUDGET // (224 + 4 * cpad)
        tile_e = min(_MAX_TILE_E, max(512, (budget_t // 128) * 128))
    assert tile_e % 128 == 0, "tile_e must be a multiple of 128"
    num_tiles = pl.cdiv(e, tile_e)
    tiles_per_core = pl.cdiv(num_tiles, 2)   # 2-way split for v7x megacore

    def split_idx(c, t):
        # Core c handles tiles [c*tiles_per_core, (c+1)*tiles_per_core).
        # The final slot of core 1 may fall past the last tile -> clamp the
        # fetch; the in-kernel validity mask zeroes its contribution, so the
        # duplicated fetch never double-counts.
        return (0, jnp.minimum(c * tiles_per_core + t, num_tiles - 1))

    # Pass 1: per-core partial bucket sums + counts, accumulated in the
    # output block (resident across the "arbitrary" reduction axis).
    partials = pl.pallas_call(
        functools.partial(_partial_sums_kernel, num_buckets=c_buckets,
                          n_elems=e, tile_e=tile_e,
                          tiles_per_core=tiles_per_core),
        out_shape=jax.ShapeDtypeStruct((2, 2, c_buckets), jnp.float32),
        grid_spec=pltpu.PrefetchScalarGridSpec(
            num_scalar_prefetch=0,
            grid=(2, tiles_per_core),
            in_specs=[pl.BlockSpec((1, tile_e), split_idx),
                      pl.BlockSpec((1, tile_e), split_idx)],
            out_specs=pl.BlockSpec((1, 2, c_buckets), lambda c, t: (c, 0, 0))),
        compiler_params=pltpu.CompilerParams(
            dimension_semantics=("parallel", "arbitrary"),
            vmem_limit_bytes=_VMEM_LIMIT_BYTES),
        cost_estimate=pl.CostEstimate(
            flops=4 * e * c_buckets, transcendentals=0,
            bytes_accessed=e * (x_bytes + 4) + 16 * c_buckets),
    )(x_flat, comb)

    # Combine the two tiny per-core partials and finalize the means (XLA).
    sums = jnp.sum(partials[:, 0, :], axis=0)                 # [C]
    cnts = jnp.sum(partials[:, 1, :], axis=0)                 # [C]
    means_flat = (sums / jnp.maximum(cnts, 1.0)).reshape(1, c_buckets)

    # Pass 2: gather bucket mean + subtract; independent tiles ("parallel").
    out_flat = pl.pallas_call(
        functools.partial(_subtract_mean_kernel, num_buckets=c_buckets),
        out_shape=jax.ShapeDtypeStruct((1, e), x_pos.dtype),
        grid_spec=pltpu.PrefetchScalarGridSpec(
            num_scalar_prefetch=0,
            grid=(num_tiles,),
            in_specs=[pl.BlockSpec((1, tile_e), lambda i: (0, i)),
                      pl.BlockSpec((1, tile_e), lambda i: (0, i)),
                      pl.BlockSpec((1, c_buckets), lambda i: (0, 0))],
            out_specs=pl.BlockSpec((1, tile_e), lambda i: (0, i))),
        compiler_params=pltpu.CompilerParams(
            dimension_semantics=("parallel",),
            vmem_limit_bytes=_VMEM_LIMIT_BYTES),
        cost_estimate=pl.CostEstimate(
            flops=2 * e * c_buckets, transcendentals=0,
            bytes_accessed=e * (2 * x_bytes + 4) + 4 * c_buckets),
    )(x_flat, comb, means_flat)

    return out_flat.reshape(n, d)


class DynamicsBase:
    """JAX/Pallas mirror of the PyTorch DynamicsBase (no parameters)."""

    def zero_center_of_mass(self, x_pos, segment_ids, num_segments, **kwargs):
        # torch's scatter_mean infers the segment count; JAX needs it static.
        return zero_center_of_mass(x_pos, segment_ids, num_segments, **kwargs)

    def forward(self, time, h_t, pos_t, edge_index, edge_attr, segment_ids,
                *args, **kwargs):
        # TODO(synk): abstract in the reference module (raises NotImplementedError)
        raise NotImplementedError

    def integrate(self, h_0, pos_0, t_seqs, method, edge_index, segment_ids,
                  *args, **kwargs):
        # TODO(synk): abstract in the reference module (raises NotImplementedError)
        raise NotImplementedError


def _reference_zcom(x_pos, segment_ids, num_segments):
    """Pure-JAX f32 reference of scatter_mean + gather + subtract."""
    x32 = x_pos.astype(jnp.float32)
    sums = jax.ops.segment_sum(x32, segment_ids, num_segments=num_segments)
    counts = jax.ops.segment_sum(jnp.ones((x32.shape[0],), jnp.float32),
                                 segment_ids, num_segments=num_segments)
    means = sums / jnp.maximum(counts[:, None], 1.0)
    return x32 - means[segment_ids]


if __name__ == "__main__":
    key = jax.random.PRNGKey(0)
    k1, k2, k3, k4, k5, k6 = jax.random.split(key, 6)
    model = DynamicsBase()
    D = 3

    # Test 1: small fused path (16 particles, 3-D positions, 4 segments).
    N1, S1 = 16, 4
    x1 = jax.random.normal(k1, (N1, D), dtype=jnp.float32)
    seg1 = jax.random.randint(k2, (N1,), 0, S1, dtype=jnp.int32)
    out1 = jax.block_until_ready(model.zero_center_of_mass(x1, seg1, S1))
    ref1 = _reference_zcom(x1, seg1, S1)
    assert out1.shape == (N1, D) and out1.dtype == x1.dtype
    assert jnp.allclose(out1, ref1, atol=1e-4, rtol=1e-4), "mismatch (test 1)"

    # Test 2: forced two-pass tiled path with an odd tile count -- exercises
    # the 2-way core split, the clamped trailing tile, and the masked tail.
    N2, S2 = 300, 5
    x2 = jax.random.normal(k3, (N2, D), dtype=jnp.float32)
    seg2 = jax.random.randint(k4, (N2,), 0, S2, dtype=jnp.int32)
    out2 = jax.block_until_ready(model.zero_center_of_mass(
        x2, seg2, S2, tile_e=384, force_two_pass=True))
    ref2 = _reference_zcom(x2, seg2, S2)
    assert out2.shape == (N2, D) and out2.dtype == x2.dtype
    assert jnp.allclose(out2, ref2, atol=1e-4, rtol=1e-4), "mismatch (test 2)"

    # Test 3: bf16 inputs stay bf16 through HBM/VMEM/MXU (f32 accumulation).
    N3, S3 = 64, 3
    x3 = jax.random.normal(k5, (N3, D), dtype=jnp.bfloat16)
    seg3 = jax.random.randint(k6, (N3,), 0, S3, dtype=jnp.int32)
    out3 = jax.block_until_ready(model.zero_center_of_mass(x3, seg3, S3))
    ref3 = _reference_zcom(x3.astype(jnp.float32), seg3, S3)
    assert out3.shape == (N3, D) and out3.dtype == x3.dtype
    assert jnp.allclose(out3.astype(jnp.float32), ref3, atol=3e-2, rtol=3e-2), \
        "mismatch (test 3)"

    print("KERNEL_OK")
</pallas_src>

<mosaic_0001>
module attributes {stable_mosaic.version = 11 : i64} {
  func.func @_fused_zcom_kernel(%arg0: i32, %arg1: memref<1x48xf32, #tpu.memory_space<vmem>>, %arg2: memref<1x48xi32, #tpu.memory_space<vmem>>, %arg3: memref<1x48xf32, #tpu.memory_space<vmem>>) attributes {dimension_semantics = [#tpu.dimension_semantics<arbitrary>], iteration_bounds = array<i64: 1>, scalar_prefetch = 0 : i64, scratch_operands = 0 : i64, tpu.core_type = #tpu.core_type<tc>, window_params = [{pipeline_mode = #tpu.pipeline_mode<synchronous>, transform_indices = @transform_0, window_bounds = array<i64: 1, 48>}, {pipeline_mode = #tpu.pipeline_mode<synchronous>, transform_indices = @transform_1, window_bounds = array<i64: 1, 48>}, {pipeline_mode = #tpu.pipeline_mode<synchronous>, transform_indices = @transform_2, window_bounds = array<i64: 1, 48>}]} {
    %c0 = arith.constant 0 : index
    %c0_0 = arith.constant 0 : index
    %0 = vector.load %arg1[%c0, %c0_0] : memref<1x48xf32, #tpu.memory_space<vmem>>, vector<1x48xf32>
    %c0_1 = arith.constant 0 : index
    %c0_2 = arith.constant 0 : index
    %1 = vector.load %arg2[%c0_1, %c0_2] : memref<1x48xi32, #tpu.memory_space<vmem>>, vector<1x48xi32>
    %2 = tpu.iota {dimensions = array<i32: 0>} : vector<12x48xi32>
    %3 = vector.broadcast %1 : vector<1x48xi32> to vector<12x48xi32>
    %4 = arith.cmpi eq, %3, %2 : vector<12x48xi32>
    %5 = arith.extui %4 : vector<12x48xi1> to vector<12x48xi32>
    %6 = arith.sitofp %5 : vector<12x48xi32> to vector<12x48xf32>
    %cst = arith.constant dense<0.000000e+00> : vector<1x12xf32>
    %7 = tpu.matmul %0, %6, %cst {dimension_numbers = #tpu.dot_dimension_numbers<[1], [1], [0], [0], [0, 0, 1, 0], [], []>} : vector<1x48xf32>, vector<12x48xf32>, vector<1x12xf32> -> vector<1x12xf32>
    %cst_3 = arith.constant 1.000000e+00 : f32
    %8 = vector.broadcast %cst_3 : f32 to vector<1x48xf32>
    %cst_4 = arith.constant dense<0.000000e+00> : vector<1x12xf32>
    %9 = tpu.matmul %8, %6, %cst_4 {dimension_numbers = #tpu.dot_dimension_numbers<[1], [1], [0], [0], [0, 0, 1, 0], [], []>} : vector<1x48xf32>, vector<12x48xf32>, vector<1x12xf32> -> vector<1x12xf32>
    %cst_5 = arith.constant 1.000000e+00 : f32
    %10 = vector.broadcast %cst_5 : f32 to vector<1x12xf32>
    %11 = arith.maximumf %9, %10 : vector<1x12xf32>
    %12 = arith.divf %7, %11 : vector<1x12xf32>
    %cst_6 = arith.constant dense<0.000000e+00> : vector<1x48xf32>
    %13 = tpu.matmul %12, %6, %cst_6 {dimension_numbers = #tpu.dot_dimension_numbers<[1], [0], [0], [1], [0, 0, 1, 1], [], []>} : vector<1x12xf32>, vector<12x48xf32>, vector<1x48xf32> -> vector<1x48xf32>
    %14 = arith.subf %0, %13 : vector<1x48xf32>
    %c0_7 = arith.constant 0 : index
    %c0_8 = arith.constant 0 : index
    %15 = vector.load %arg3[%c0_7, %c0_8] : memref<1x48xf32, #tpu.memory_space<vmem>>, vector<1x48xf32>
    tpu.vector_store %arg3[%c0_7, %c0_8], %14 {strides = array<i32>} : memref<1x48xf32, #tpu.memory_space<vmem>>, vector<1x48xf32>,
    return
  }
  func.func @transform_0(%arg0: i32) -> (i32, i32) {
    %c0_i32 = arith.constant 0 : i32
    %c0_i32_0 = arith.constant 0 : i32
    %c0_i32_1 = arith.constant 0 : i32
    return %c0_i32, %c0_i32_0 : i32, i32
  }
  func.func @transform_1(%arg0: i32) -> (i32, i32) {
    %c0_i32 = arith.constant 0 : i32
    %c0_i32_0 = arith.constant 0 : i32
    %c0_i32_1 = arith.constant 0 : i32
    return %c0_i32, %c0_i32_0 : i32, i32
  }
  func.func @transform_2(%arg0: i32) -> (i32, i32) {
    %c0_i32 = arith.constant 0 : i32
    %c0_i32_0 = arith.constant 0 : i32
    %c0_i32_1 = arith.constant 0 : i32
    return %c0_i32, %c0_i32_0 : i32, i32
  }
}

</mosaic_0001>

<bundles_post_ra>
// kernel: tpu_custom_call.1
= control target key start
LH: loop header
LB: loop body
LE: loop exit
PB: predicated region body
PF: predicated region fallthrough
CT: control target
= control target key end

     0   :  { %7 = vsyncpa [#allocation3], 0  ;;  %s295_s0 = inlined_call_operand.hbm [shape: f32[1,48], index: 0, kind: input, shape index: {}]   ;;  %s296_s1 = inlined_call_operand.hbm [shape: s32[1,48], index: 1, kind: input, shape index: {}]   ;;  %s297_s2 = inlined_call_operand.hbm [shape: f32[1,48], index: 2, kind: output, shape index: {}]  }
   0x1   :  { %8 = vsyncpa [#allocation6], 0 }
   0x2   :  { %9 = vsyncpa [#allocation4], 0  ;;  %s15_s11 = sshll.u32 %s295_s0, 4  ;;  %s266_s12 = smov [#allocation2]   ;;  %s16_s11 = int_to_ptr.hbm [resolvable:$true] %s15_s11 }
   0x3   :  { %s17_s13 = sshll.u32 %s266_s12, 4  ;;  %s26_s16 = sshll.u32 %s296_s1, 4  ;;  %s18_s13 = int_to_ptr.vmem [resolvable:$true] %s17_s13  ;;  %s27_s16 = int_to_ptr.hbm [resolvable:$true] %s26_s16 }
   0x4   :  { %20 = dma.hbm_to_vmem [thread:$0]  %s16_s11, 16, %s18_s13, [#allocation3]  }
   0x5   :  { %s267_s17 = smov [#allocation5]  }
   0x6   :  { %s28_s18 = sshll.u32 %s267_s17, 4  ;;  %s29_s18 = int_to_ptr.vmem [resolvable:$true] %s28_s18 }
   0x7   :  { %31 = dma.hbm_to_vmem [thread:$0]  %s27_s16, 16, %s29_s18, [#allocation6]  }
   0x8   :  { %260 = dma.done.wait [#allocation3], 16  }
   0x9   :  { %261 = vsyncadd [#allocation3], 4294967280 }
   0xa   :  { %262 = dma.done.wait [#allocation6], 16  }
   0xb   :  { %263 = vsyncadd [#allocation6], 4294967280  ;;  %v42_v0 = vlaneseq  ;;  %v185_v3 = vld [vmem:[#allocation5] ss:$0 sm:$0xff]  ;;  %vm52_vm0 = vcmask 392192   ;;  %v268_v4 = vmov 0.0  }
   0xc   :  { %v40_v7 = vld [vmem:[#allocation2] sm:$0x1]  ;;  %v269_v8 = vmov 1.0   ;;  %vm125_vm3 = vcmask 1043456   ;;  %vm121_vm8 = vcmask 97280   ;;  %s270_s0 = smov [#allocation7]  }
   0xd   :  { %v43_v1 = vshrl.u32 %v42_v0, 7  ;;  %s156_s1 = sshll.u32 %s270_s0, 4  ;;  %s158_s21 = sshll.u32 %s297_s2, 4  ;;  %vm149_vm9 = vcmask 385024   ;;  %s157_s1 = int_to_ptr.vmem [resolvable:$true] %s156_s1  ;;  %s159_s21 = int_to_ptr.hbm [resolvable:$true] %s158_s21 }
   0xf   :  { %v44_v2 = vadd.s32 8, %v43_v1  ;;  %vm46_vm2 = vcmp.eq.s32.totalorder %v185_v3, %v43_v1 }
  0x10   :  { %v169_v6 = vsel %vm46_vm2, 1.0, %v268_v4 }
  0x11   :  { %vm47_vm1 = vcmp.eq.s32.totalorder %v185_v3, %v44_v2 }
  0x12   :  { %v170_v5 = vsel %vm47_vm1, 1.0, %v268_v4 }
  0x13   :  { %174 = vmatpush.xpose.msk.msra.mxu1 %vm52_vm0, %v170_v5  ;;  %171 = vmatpush.xpose.msk.msra.mxu0 %vm52_vm0, %v170_v5 }
  0x14   :  { %177 = vmatpush.msk.msra.mxu2 %vm125_vm3, %v170_v5 }
  0x16   :  { %178 = vmatpush.msk.msra.mxu2 %vm46_vm2, %v269_v8 }
  0x17   :  { %175 = vmatpush.xpose.msk.msra.mxu1 %vm52_vm0, %v169_v6  ;;  %172 = vmatpush.xpose.msk.msra.mxu0 %vm52_vm0, %v169_v6 }
  0x1a   :  { %176 = vmatmul.msk.f32.vlgmr.msra.gmra.mxu1 %vm52_vm0, %v269_v8  ;;  %173 = vmatmul.msk.f32.vlgmr.msra.gmra.mxu0 %vm52_vm0, %v40_v7 }
  0x97   :  { %v102_v9 = vpop.f32.mrf.mxu1  ;;  %v79_v18 = vpop.f32.mrf.mxu0 }
  0x98   :  { %v105_v10 = vmax.f32 %v102_v9, 1.0 }
  0x9a   :  { %186 = vrcp.f32 %v105_v10  ;;  %v117_v14 = vand.u32 2147483648, %v105_v10  ;;  %v115_v16 = vand.u32 2147483647, %v105_v10  ;;  %vm111_vm5 = vweird.f32 %v105_v10 }
  0x9c   :  { %v118_v19 = vor.u32 1.1754944e-38, %v117_v14  ;;  %vm116_vm7 = vcmp.eq.f32.partialorder %v115_v16, 8.507059e+37 }
  0xa0   :  { %v187_v11 = vpop.eup %186 }
  0xa1   :  { %v107_v12 = vmul.f32 %v187_v11, %v105_v10  ;;  %vm112_vm4 = vweird.f32 %v187_v11 }
  0xa2   :  { %vm113_vm6 = vmor %vm111_vm5, %vm112_vm4 }
  0xa3   :  { %v108_v13 = vsub.f32 1.0, %v107_v12 }
  0xa5   :  { %v109_v15 = vmul.f32 %v187_v11, %v108_v13 }
  0xa7   :  { %v110_v17 = vadd.f32 %v187_v11, %v109_v15 }
  0xa9   :  { %v114_v20 = vsel %vm113_vm6, %v187_v11, %v110_v17 }
  0xaa   :  { %v119_v21 = vsel %vm116_vm7, %v118_v19, %v114_v20 }
  0xab   :  { %v120_v22 = vmul.f32 %v119_v21, %v79_v18 }
  0xad   :  { %179 = vmatmul.msk.f32.vlgmr.msra.gmra.mxu2 %vm121_vm8, %v120_v22 }
 0x130   :  { %v145_v23 = vpop.f32.mrf.mxu2 }
 0x131   :  { %v148_v24 = vsub.f32 %v40_v7, %v145_v23 }
 0x133   :  { %150 = vst.msk [vmem:[#allocation7] sm:$0x1] %vm149_vm9, %v148_v24 }
 0x134   :  { %161 = dma.vmem_to_hbm [thread:$0]  %s157_s1, 16, %s159_s21, [#allocation4]  }
 0x135   :  { %264 = dma.done.wait [#allocation4], 16  }
 0x136   :  { %265 = vsyncadd [#allocation4], 4294967280 }
 0x137   :  { %166 = vsyncpa [#allocation3], 1 }
 0x138   :  { %167 = vsyncpa [#allocation6], 1 }
 0x139   :  { %168 = vsyncpa [#allocation4], 1 }

</bundles_post_ra>
